<compile_context>
chip_gen: v6e
topology: v6e:2x2x1
jax: 0.10.0
libtpu: 0.0.40
codegen_flags: <defaults>
</compile_context>

<pallas_src>
import functools

import jax
import jax.numpy as jnp
from jax.experimental import pallas as pl
from jax.experimental.pallas import tpu as pltpu

_LANE = 128   # lane width
_SUB = 8      # sublane granularity for f32 row tiles


def _round_up(x, m):
    return (x + m - 1) // m * m


def _vmem_cap_bytes():
    """~75% of physical per-core VMEM; leaves headroom for Mosaic scratch."""
    try:
        return int(pltpu.get_tpu_info().vmem_capacity_bytes) * 3 // 4
    except Exception:
        return 48 * 1024 * 1024   # conservative default (v7x has 64 MiB / TC)


def _mlp_kernel(x_ref, w1_ref, b1_ref, w2_ref, b2_ref, o_ref):
    """Fused 2-layer MLP: out = relu(x @ W1 + b1) @ W2 + b2.

    x arrives f32 straight from HBM and is cast to bf16 in-register (free VPU
    work hidden under the MXU).  Both matmuls accumulate in f32.  Bias add,
    ReLU and the output store stay f32 (v5e-safe epilogue).  Dropout is
    inference-mode identity.
    """
    x = x_ref[...].astype(jnp.bfloat16)                               # (tile, Din)
    h = jnp.dot(x, w1_ref[...], preferred_element_type=jnp.float32)  # MXU, f32 acc
    h = h + b1_ref[...]                                               # (1, H) broadcast
    h = jnp.maximum(h, 0.0)                                           # F.relu
    h = h.astype(w2_ref.dtype)                                        # bf16 for 2nd matmul
    o = jnp.dot(h, w2_ref[...], preferred_element_type=jnp.float32)  # (tile, Dout)
    o = o + b2_ref[...]
    o_ref[...] = o.astype(o_ref.dtype)


def prepare_mlp_params(w1, b1, w2, b2):
    """One-time weight prep: bf16 matmul weights, f32 2-D biases.

    Call once outside the per-forward path so the kernel never re-reads /
    re-writes the weights just to cast them.
    """
    w1 = jnp.asarray(w1, jnp.bfloat16)
    w2 = jnp.asarray(w2, jnp.bfloat16)
    b1 = jnp.asarray(b1, jnp.float32).reshape(1, -1)
    b2 = jnp.asarray(b2, jnp.float32).reshape(1, -1)
    return w1, b1, w2, b2


@functools.partial(jax.jit, static_argnames=("tile_n",))
def mlp_forward(x, w1, b1, w2, b2, *, tile_n=512):
    """Pallas-backed forward of the MultiLayerPerceptron head.

    x : (N, Din) float32 node features (output of the GNN stage)
    w1: (Din, H) bf16, b1: (1, H) f32, w2: (H, Dout) bf16, b2: (1, Dout) f32
        (use prepare_mlp_params(); f32 weights are also accepted and cast at
         trace time)
    returns (N, Dout) float32
    """
    N, Din = x.shape
    H = w1.shape[1]
    Dout = w2.shape[1]

    # Trace-time no-ops when params were prepared with prepare_mlp_params.
    x = x.astype(jnp.float32)
    w1 = w1.astype(jnp.bfloat16)
    w2 = w2.astype(jnp.bfloat16)
    b1 = b1.astype(jnp.float32).reshape(1, H)
    b2 = b2.astype(jnp.float32).reshape(1, Dout)

    # Row tile: multiple of 8, capped at tile_n, chosen so the grid has >= 2
    # steps whenever N allows it (shard across v7x's 2 TensorCores).
    tile = min(_round_up(tile_n, _SUB), _round_up(pl.cdiv(N, 2), _SUB))
    tile = max(tile, _SUB)
    grid_n = pl.cdiv(N, tile)          # partial edge block handled by Pallas

    # VMEM budget estimate (accounts for lane/sublane padding of buffers).
    def _buf_bytes(rows, cols, itemsize, sub):
        return _round_up(rows, sub) * _round_up(cols, _LANE) * itemsize

    vmem_bytes = (
        2 * _buf_bytes(tile, Din, 4, _SUB)    # x tile, f32, double-buffered
        + 2 * _buf_bytes(tile, Dout, 4, _SUB)  # out tile, f32, double-buffered
        + 2 * _buf_bytes(Din, H, 2, 16)        # W1, bf16
        + 2 * _buf_bytes(H, Dout, 2, 16)       # W2, bf16
        + 2 * _buf_bytes(1, H, 4, _SUB)        # b1, f32
        + 2 * _buf_bytes(1, Dout, 4, _SUB)     # b2, f32
    )
    vmem_limit = int(min(_vmem_cap_bytes(), max(2 * vmem_bytes, 32 * 1024 * 1024)))

    cost = pl.CostEstimate(
        flops=2 * N * (Din * H + H * Dout),
        transcendentals=0,
        bytes_accessed=(
            N * Din * 4 + Din * H * 2 + H * Dout * 2 + (H + Dout) * 4 + N * Dout * 4
        ),
    )

    return pl.pallas_call(
        _mlp_kernel,
        out_shape=jax.ShapeDtypeStruct((N, Dout), jnp.float32),
        grid_spec=pltpu.PrefetchScalarGridSpec(
            num_scalar_prefetch=0,
            grid=(grid_n,),
            in_specs=[
                # row tile of node features (f32, cast in-kernel)
                pl.BlockSpec((tile, Din), lambda i: (i, 0)),
                # weights/biases: full arrays, resident across the grid
                pl.BlockSpec((Din, H), lambda i: (0, 0)),
                pl.BlockSpec((1, H), lambda i: (0, 0)),
                pl.BlockSpec((H, Dout), lambda i: (0, 0)),
                pl.BlockSpec((1, Dout), lambda i: (0, 0)),
            ],
            # Compact (tile, Dout) output block: no lane-padded f32 slab, no
            # post-kernel slice pass.
            out_specs=pl.BlockSpec((tile, Dout), lambda i: (i, 0)),
        ),
        compiler_params=pltpu.CompilerParams(
            dimension_semantics=("parallel",),
            vmem_limit_bytes=vmem_limit,
        ),
        cost_estimate=cost,
    )(x, w1, b1, w2, b2)


def init_mlp_params(key, in_channels, hid_channels, out_channels):
    """Deterministic init mirroring nn.Linear default (U[-1/sqrt(fan_in), +])."""
    k1, k2, k3, k4 = jax.random.split(key, 4)
    lim1 = 1.0 / jnp.sqrt(jnp.float32(in_channels))
    lim2 = 1.0 / jnp.sqrt(jnp.float32(hid_channels))
    w1 = jax.random.uniform(k1, (in_channels, hid_channels), jnp.float32, -lim1, lim1)
    b1 = jax.random.uniform(k2, (1, hid_channels), jnp.float32, -lim1, lim1)
    w2 = jax.random.uniform(k3, (hid_channels, out_channels), jnp.float32, -lim2, lim2)
    b2 = jax.random.uniform(k4, (1, out_channels), jnp.float32, -lim2, lim2)
    return w1, b1, w2, b2


def _ref_mlp(x, w1, b1, w2, b2):
    return jnp.maximum(x @ w1 + b1, 0.0) @ w2 + b2


if __name__ == "__main__":
    # Small synthetic shapes consistent with the module:
    #   N    = 16 graph nodes (proteins)
    #   Din  = 32 (stand-in for gnn_hid_channels == encoder.output_dim)
    #   H    = 32 (mlp_hid_channels, defaults to encoder.output_dim)
    #   Dout = 1  (out_channels default)
    N, Din, H, Dout = 16, 32, 32, 1

    key = jax.random.PRNGKey(0)
    kx, kp, kx2 = jax.random.split(key, 3)
    # x plays the role of the GNN-stage output node embeddings.
    x = jax.random.normal(kx, (N, Din), dtype=jnp.float32)
    w1, b1, w2, b2 = init_mlp_params(kp, Din, H, Dout)

    # One-time weight prep (bf16 cast) outside the per-call jitted path.
    w1p, b1p, w2p, b2p = prepare_mlp_params(w1, b1, w2, b2)

    out = jax.block_until_ready(mlp_forward(x, w1p, b1p, w2p, b2p))
    ref = _ref_mlp(x, w1, b1, w2, b2)
    assert out.shape == (N, Dout)
    # bf16 matmuls with f32 accumulation -> loose-ish tolerance vs. f32 reference.
    assert jnp.allclose(out, ref, atol=5e-2, rtol=5e-2), float(jnp.max(jnp.abs(out - ref)))

    # Exercise the multi-grid-step path with a partial edge block
    # (N not a multiple of the row tile).
    N2 = 1000
    x2 = jax.random.normal(kx2, (N2, Din), dtype=jnp.float32)
    out2 = jax.block_until_ready(mlp_forward(x2, w1p, b1p, w2p, b2p, tile_n=512))
    ref2 = _ref_mlp(x2, w1, b1, w2, b2)
    assert out2.shape == (N2, Dout)
    assert jnp.allclose(out2, ref2, atol=5e-2, rtol=5e-2), float(jnp.max(jnp.abs(out2 - ref2)))

    print("KERNEL_OK")
</pallas_src>

<mosaic_0001>
module attributes {stable_mosaic.version = 11 : i64} {
  func.func @_mlp_kernel(%arg0: i32, %arg1: memref<8x32xf32, #tpu.memory_space<vmem>>, %arg2: memref<32x32xbf16, #tpu.memory_space<vmem>>, %arg3: memref<1x32xf32, #tpu.memory_space<vmem>>, %arg4: memref<32x1xbf16, #tpu.memory_space<vmem>>, %arg5: memref<1x1xf32, #tpu.memory_space<vmem>>, %arg6: memref<8x1xf32, #tpu.memory_space<vmem>>) attributes {dimension_semantics = [#tpu.dimension_semantics<parallel>], iteration_bounds = array<i64: 2>, scalar_prefetch = 0 : i64, scratch_operands = 0 : i64, tpu.core_type = #tpu.core_type<tc>, window_params = [{transform_indices = @transform_0, window_bounds = array<i64: 8, 32>}, {pipeline_mode = #tpu.pipeline_mode<synchronous>, transform_indices = @transform_1, window_bounds = array<i64: 32, 32>}, {pipeline_mode = #tpu.pipeline_mode<synchronous>, transform_indices = @transform_2, window_bounds = array<i64: 1, 32>}, {pipeline_mode = #tpu.pipeline_mode<synchronous>, transform_indices = @transform_3, window_bounds = array<i64: 32, 1>}, {pipeline_mode = #tpu.pipeline_mode<synchronous>, transform_indices = @transform_4, window_bounds = array<i64: 1, 1>}, {transform_indices = @transform_5, window_bounds = array<i64: 8, 1>}]} {
    %c0 = arith.constant 0 : index
    %c0_0 = arith.constant 0 : index
    %0 = vector.load %arg1[%c0, %c0_0] : memref<8x32xf32, #tpu.memory_space<vmem>>, vector<8x32xf32>
    %1 = arith.truncf %0 : vector<8x32xf32> to vector<8x32xbf16>
    %c0_1 = arith.constant 0 : index
    %c0_2 = arith.constant 0 : index
    %2 = vector.load %arg2[%c0_1, %c0_2] : memref<32x32xbf16, #tpu.memory_space<vmem>>, vector<32x32xbf16>
    %cst = arith.constant dense<0.000000e+00> : vector<8x32xf32>
    %3 = tpu.matmul %1, %2, %cst {dimension_numbers = #tpu.dot_dimension_numbers<[1], [0], [0], [1], [0, 0, 1, 1], [], []>} : vector<8x32xbf16>, vector<32x32xbf16>, vector<8x32xf32> -> vector<8x32xf32>
    %c0_3 = arith.constant 0 : index
    %c0_4 = arith.constant 0 : index
    %4 = vector.load %arg3[%c0_3, %c0_4] : memref<1x32xf32, #tpu.memory_space<vmem>>, vector<1x32xf32>
    %5 = vector.broadcast %4 : vector<1x32xf32> to vector<8x32xf32>
    %6 = arith.addf %3, %5 : vector<8x32xf32>
    %cst_5 = arith.constant 0.000000e+00 : f32
    %7 = vector.broadcast %cst_5 : f32 to vector<8x32xf32>
    %8 = arith.maximumf %6, %7 : vector<8x32xf32>
    %9 = arith.truncf %8 : vector<8x32xf32> to vector<8x32xbf16>
    %c0_6 = arith.constant 0 : index
    %c0_7 = arith.constant 0 : index
    %10 = vector.load %arg4[%c0_6, %c0_7] : memref<32x1xbf16, #tpu.memory_space<vmem>>, vector<32x1xbf16>
    %cst_8 = arith.constant dense<0.000000e+00> : vector<8x1xf32>
    %11 = tpu.matmul %9, %10, %cst_8 {dimension_numbers = #tpu.dot_dimension_numbers<[1], [0], [0], [1], [0, 0, 1, 1], [], []>} : vector<8x32xbf16>, vector<32x1xbf16>, vector<8x1xf32> -> vector<8x1xf32>
    %c0_9 = arith.constant 0 : index
    %c0_10 = arith.constant 0 : index
    %12 = vector.load %arg5[%c0_9, %c0_10] : memref<1x1xf32, #tpu.memory_space<vmem>>, vector<1x1xf32>
    %13 = vector.broadcast %12 : vector<1x1xf32> to vector<8x1xf32>
    %14 = arith.addf %11, %13 : vector<8x1xf32>
    %c0_11 = arith.constant 0 : index
    %c0_12 = arith.constant 0 : index
    %15 = vector.load %arg6[%c0_11, %c0_12] : memref<8x1xf32, #tpu.memory_space<vmem>>, vector<8x1xf32>
    tpu.vector_store %arg6[%c0_11, %c0_12], %14 {strides = array<i32>} : memref<8x1xf32, #tpu.memory_space<vmem>>, vector<8x1xf32>,
    return
  }
  func.func @transform_0(%arg0: i32) -> (i32, i32) {
    %c0_i32 = arith.constant 0 : i32
    %c0_i32_0 = arith.constant 0 : i32
    return %arg0, %c0_i32 : i32, i32
  }
  func.func @transform_1(%arg0: i32) -> (i32, i32) {
    %c0_i32 = arith.constant 0 : i32
    %c0_i32_0 = arith.constant 0 : i32
    %c0_i32_1 = arith.constant 0 : i32
    return %c0_i32, %c0_i32_0 : i32, i32
  }
  func.func @transform_2(%arg0: i32) -> (i32, i32) {
    %c0_i32 = arith.constant 0 : i32
    %c0_i32_0 = arith.constant 0 : i32
    %c0_i32_1 = arith.constant 0 : i32
    return %c0_i32, %c0_i32_0 : i32, i32
  }
  func.func @transform_3(%arg0: i32) -> (i32, i32) {
    %c0_i32 = arith.constant 0 : i32
    %c0_i32_0 = arith.constant 0 : i32
    %c0_i32_1 = arith.constant 0 : i32
    return %c0_i32, %c0_i32_0 : i32, i32
  }
  func.func @transform_4(%arg0: i32) -> (i32, i32) {
    %c0_i32 = arith.constant 0 : i32
    %c0_i32_0 = arith.constant 0 : i32
    %c0_i32_1 = arith.constant 0 : i32
    return %c0_i32, %c0_i32_0 : i32, i32
  }
  func.func @transform_5(%arg0: i32) -> (i32, i32) {
    %c0_i32 = arith.constant 0 : i32
    %c0_i32_0 = arith.constant 0 : i32
    return %arg0, %c0_i32 : i32, i32
  }
}

</mosaic_0001>

<bundles_post_ra>
// kernel: mlp_forward.1
= control target key start
LH: loop header
LB: loop body
LE: loop exit
PB: predicated region body
PF: predicated region fallthrough
CT: control target
= control target key end

     0   :  { %s637_s0 = inlined_call_operand.vmem [shape: f32[16,32], index: 0, kind: input, shape index: {}]   ;;  %s638_s1 = inlined_call_operand.hbm [shape: bf16[32,32], index: 1, kind: input, shape index: {}]   ;;  %s639_s2 = inlined_call_operand.vmem [shape: f32[1,32], index: 2, kind: input, shape index: {}]   ;;  %s640_s3 = inlined_call_operand.vmem [shape: bf16[32,1], index: 3, kind: input, shape index: {}]   ;;  %s641_s4 = inlined_call_operand.<no memory space> [shape: f32[1,1], index: 4, kind: input, shape index: {}]   ;;  %s642_s5 = inlined_call_operand.vmem [shape: f32[16,1], index: 5, kind: output, shape index: {}]  }
   0x1   :  { %v10_v0 = vstv %s641_s4 }
   0x2   :  { %11 = vst [vmem:[#allocation2] sm:$0x1] %v10_v0 }
   0x3   :  { %12 = vsyncpa [#allocation4], 0  ;;  %s586_s20 = smov 0  }
   0x4 LB: > { %s592_s21 = sadd.s32 4294967295, %s546_s20   ;;  %p444_p0 = scmp.ge.s32.totalorder %s546_s20, 1  ;;  %s546_s20 = sphi %s586_s20, %s18_s20  }
   0x5   : > { %p159_p1 = scmp.lt.s32.totalorder %s546_s20, 3  ;;  %s548_s22 = smov [#allocation3]  }
   0x6   : > { %s171_s4 = sshll.u32 %s548_s22, 4  ;;  %p491_p3 = scmp.eq.s32.totalorder %s592_s21, 0  ;;  %s172_s4 = int_to_ptr.vmem [resolvable:$true] %s171_s4 }
   0x7   : > { %p596_p2 = pnand %p444_p0, %p159_p1  ;;  %s521_s24 = scalar_lea.vmem %s172_s4, 256 }
   0x8   : > { %p522_p7 = scmp.ne.s32.totalorder %s172_s4, %s521_s24  ;;  %p529_p10 = scmp.lt.s32.totalorder %s172_s4, %s172_s4 }
   0x9   : > { %p487_p4 = pneg %p596_p2  ;;  %p530_p11 = scmp.lt.s32.totalorder %s521_s24, %s521_s24 }
   0xb   : > { %p488_p5 = pnand %p491_p3, %p487_p4  ;;  %p531_p12 = por %p530_p11, %p529_p10 }
   0xd   : > { %p512_p6 = pneg %p488_p5 }
   0xf   : > { %p524_p8 = pnand %p522_p7, %p512_p6 }
  0x11   : > { %p525_p9 = pneg %p524_p8 }
  0x13   : > { %p532_p13 = pnand %p531_p12, %p525_p9 }
  0x15   : > { %535 = shalt.err (!%p532_p13)
}
  0x16   : > { %s549_s25 = smov 64   ;;  %s550_s26 = smov 4  }
  0x17   : > { %490 = dma.hbm_to_vmem [thread:$0]  (!%p488_p5), %s638_s1, 256, %s172_s4, [#allocation4], %s549_s25, %s549_s25, %s550_s26  }
  0x18   : > { %203 = sbr.rel (%p596_p2) target bundleno = 438 (0x1b6), region = 40 }
  0x1d   : > { %541 = dma.done.wait (%p491_p3), [#allocation4], 256  }
  0x1e   : > { %543 = vsyncadd (%p491_p3), [#allocation4], 4294967040  ;;  %p229_p0 = scmp.lt.s32.totalorder %s592_s21, 1  ;;  %v551_v1 = vmov 0.0   ;;  %vm552_vm0 = vmmov 0   ;;  %v506_v2 = vld [vmem:[#allocation3 + $0x8] sm:$0xff]  }
  0x1f   : > { %467 = vmatprep.subr.bf16.mxu0 %v551_v1  ;;  %471 = vmatprep.mubr.msk.bf16.mxu0 %vm552_vm0, %v551_v1  ;;  %v507_v3 = vld [vmem:[#allocation3] sm:$0xff]   ;;  %vm263_vm1 = vcmask 261120   ;;  %v451_v8 = vld [vmem:[%s639_s2] ss:$0 sm:$0xff]  ;;  %vm375_vm2 = vcmask 7168  }
  0x20   : > { %s645_s21 = smov (!%p229_p0, %s592_s21), 1  ;;  %475 = vmatprep.subr.bf16.mxu1 %v551_v1  ;;  %479 = vmatprep.mubr.msk.bf16.mxu1 %vm552_vm0, %v551_v1  ;;  %v508_v6 = vld [vmem:[%s640_s3 + $0x8] sm:$0xff]   ;;  %v509_v7 = vld [vmem:[%s640_s3] sm:$0xff]  }
  0x21   : > { %s449_s29 = sshll.u32 %s645_s21, 3  ;;  %468 = vmatpush3.bf16.msra.mxu0 %v506_v2  ;;  %476 = vmatpush3.bf16.msra.mxu1 %v508_v6  ;;  %v455_v16 = vld [vmem:[#allocation2] ss:$0 sm:$0xff] }
  0x22   : > { %s232_s7 = scalar_lea.vmem %s637_s0, %s449_s29  ;;  %469 = vmatprep.subr.bf16.mxu0 %v551_v1  ;;  %477 = vmatprep.subr.bf16.mxu1 %v551_v1  ;;  %s236_s16 = scalar_lea.vmem %s642_s5, %s449_s29 }
  0x23   : > { %v238_v4 = vld [vmem:[%s232_s7] sm:$0xff] }
  0x24   : > { %v239_v5 = vpack.c.bf16 %v238_v4, %v238_v4 }
  0x25   : > { %470 = vmatpush3.bf16.msra.mxu0 %v507_v3  ;;  %478 = vmatpush3.bf16.msra.mxu1 %v509_v7 }
  0x28   : > { %472 = vmatmul.mubr.msk.bf16.vlgmr.msra.gmra.mxu0 %vm263_vm1, %v239_v5 }
  0xe8   : > { %v301_v9 = vpop.f32.mrf.mxu0 }
  0xe9   : > { %v302_v10 = vadd.f32 %v451_v8, %v301_v9 }
  0xea   : > { %v473_v11 = vpop.f32.mrf.mxu0 }
  0xeb   : > { %v307_v12 = vmax.f32 %v302_v10, 0.0 }
  0xec   : > { %v304_v13 = vpop.f32.mrf.mxu0 }
  0xed   : > { %v308_v14 = vpack.c.bf16 %v307_v12, %v307_v12 }
  0xee   : > { %v474_v15 = vpop.f32.mrf.mxu0 }
  0xef   : > { %480 = vmatmul.mubr.msk.bf16.vlgmr.msra.gmra.mxu1 %vm263_vm1, %v308_v14 }
 0x1af   : > { %v369_v17 = vpop.f32.mrf.mxu1 }
 0x1b0   : > { %v370_v18 = vadd.f32 %v455_v16, %v369_v17 }
 0x1b1   : > { %v481_v19 = vpop.f32.mrf.mxu1 }
 0x1b2   : > { %376 = vst.msk [vmem:[%s236_s16] sm:$0xff] %vm375_vm2, %v370_v18 }
 0x1b3   : > { %v372_v20 = vpop.f32.mrf.mxu1 }
 0x1b5   : > { %v482_v21 = vpop.f32.mrf.mxu1 }
 0x1b6 PF: > { %s18_s20 = sadd.s32 1, %s546_s20  }
 0x1b7   : > { %p15_p1 = scmp.ge.s32.totalorder %s18_s20, 4  }
 0x1b9   :  { %17 = sbr.rel (!%p15_p1) target bundleno = 4 (0x4), region = 75 }
 0x1be   :  { %396 = vsyncpa [#allocation4], 1 }
 0x1bf   :  { %398 = vsyncpa [#allocation4 + $0x1], 1 }

</bundles_post_ra>
